<compile_context>
chip_gen: v6e
topology: v6e:2x2x1
jax: 0.10.0
libtpu: 0.0.40
codegen_flags: <defaults>
</compile_context>

<pallas_src>
import math

import jax
import jax.numpy as jnp
from jax import lax
from jax.experimental import pallas as pl
from jax.experimental.pallas import tpu as pltpu

_VMEM = pl.BlockSpec(memory_space=pltpu.MemorySpace.VMEM)
_SMEM = pl.BlockSpec(memory_space=pltpu.MemorySpace.SMEM)
_BF16 = jnp.bfloat16
_TAU = 0.4
_VMEM_LIMIT = 32 * 1024 * 1024


# ----------------------------------------------------------------------------
# small in-kernel helpers (pure jnp, traced inside kernels)
# ----------------------------------------------------------------------------
def _sum11(v):
    """Full reduction of a 2-D array to a (1, 1) array."""
    return jnp.sum(jnp.sum(v, axis=-1, keepdims=True), axis=0, keepdims=True)


def _l2norm_rows(v, eps=1e-12):
    # x / max(||x||, eps)  ==  x * rsqrt(max(||x||^2, eps^2))  -> EUP rsqrt
    return v * lax.rsqrt(jnp.maximum(jnp.sum(v * v, axis=-1, keepdims=True),
                                     eps * eps))


# ----------------------------------------------------------------------------
# K1: fused 2-layer GCN encoder, grid=(2,) over branches (node / edge graph)
# ----------------------------------------------------------------------------
def _encoder_kernel(a_ref, x_ref, w1_ref, b1_ref, w2_ref, b2_ref,
                    p1_ref, p2_ref, o_ref):
    a = a_ref[0]                                   # (N, N) bf16 (cast in glue)
    x = x_ref[0]                                   # (N, F) bf16
    xw = jnp.dot(x, w1_ref[...].astype(_BF16), preferred_element_type=jnp.float32)
    h1 = jnp.dot(a, xw.astype(_BF16), preferred_element_type=jnp.float32) + b1_ref[...]
    p1 = p1_ref[0, 0]
    h1 = jnp.where(h1 > 0, h1, p1 * h1)            # PReLU
    hw = jnp.dot(h1.astype(_BF16), w2_ref[...].astype(_BF16),
                 preferred_element_type=jnp.float32)
    h2 = jnp.dot(a, hw.astype(_BF16), preferred_element_type=jnp.float32) + b2_ref[...]
    p2 = p2_ref[0, 0]
    o_ref[...] = jnp.where(h2 > 0, h2, p2 * h2)


def run_encoder(params, a_stack_bf16, x_stack_bf16):
    # TODO(synk): for large N, additionally tile rows / split the 2-layer GCN
    # across a reduction grid axis; at small-to-moderate N whole-branch VMEM
    # residency plus the parallel branch axis is the right shape.
    _, n, _ = a_stack_bf16.shape
    f = x_stack_bf16.shape[-1]
    h = params["enc_w1"].shape[1]
    return pl.pallas_call(
        _encoder_kernel,
        grid=(2,),
        in_specs=[
            pl.BlockSpec((1, n, n), lambda b: (b, 0, 0)),
            pl.BlockSpec((1, n, f), lambda b: (b, 0, 0)),
            _VMEM, _VMEM, _VMEM, _VMEM,            # shared weights, resident
            _SMEM, _SMEM,                          # PReLU slopes
        ],
        out_specs=pl.BlockSpec((n, h), lambda b: (b, 0)),
        out_shape=jax.ShapeDtypeStruct((2 * n, h), jnp.float32),
        compiler_params=pltpu.CompilerParams(
            dimension_semantics=("parallel",),
            vmem_limit_bytes=_VMEM_LIMIT),
    )(a_stack_bf16, x_stack_bf16, params["enc_w1"], params["enc_b1"],
      params["enc_w2"], params["enc_b2"], params["enc_p1"], params["enc_p2"])


# ----------------------------------------------------------------------------
# K2: encoder_to_decoder + mask + GCN decoder + SCE node loss + edge-cos loss
#     (edge gathers replaced by <W, hn hn^T> with a scatter-added weight matrix)
# ----------------------------------------------------------------------------
def _make_recon_edge_kernel(alpha, n):
    a_int = int(alpha) if float(alpha).is_integer() else None

    def kernel(hall_ref, e2d_ref, a_ref, dw_ref, db_ref, x_ref,
               nmask_ref, wedge_ref, node_loss_ref, edge_loss_ref):
        encn = hall_ref[pl.ds(0, n), :]            # node branch (enc_rep_node)
        ence = hall_ref[pl.ds(n, n), :]            # edge branch (enc_rep_edge)

        # encoder_to_decoder (bias=False) then zero masked rows (decoder is GCN)
        rep = jnp.dot(encn.astype(_BF16), e2d_ref[...].astype(_BF16),
                      preferred_element_type=jnp.float32)
        nmask = nmask_ref[...]                     # (N,1): 1.0 on masked nodes
        rep = rep * (1.0 - nmask)
        # decoder: A @ (rep @ W_dec) + b   (single GCN layer, no activation)
        rw = jnp.dot(rep.astype(_BF16), dw_ref[...].astype(_BF16),
                     preferred_element_type=jnp.float32)
        recon = jnp.dot(a_ref[...], rw.astype(_BF16),
                        preferred_element_type=jnp.float32) + db_ref[...]

        # SCE loss on masked nodes: mean_{mask}( (1 - cos(recon, x))^alpha )
        rn = _l2norm_rows(recon)
        xn = _l2norm_rows(x_ref[...])
        sce = 1.0 - jnp.sum(rn * xn, axis=-1, keepdims=True)
        if a_int is not None:
            out = sce
            for _ in range(a_int - 1):
                out = out * sce
        else:
            out = sce ** alpha
        node_loss_ref[...] = (_sum11(out * nmask) /
                              jnp.maximum(_sum11(nmask), 1.0))

        # edge loss: pos_loss = -(mean_{masked e} cos(h_src, h_dst) + 1e-15)
        #   sum_e cos = sum_{ij} W_ij * (hn hn^T)_ij, W = scatter-add of emask.
        hn = _l2norm_rows(ence).astype(_BF16)
        dn = (((1,), (1,)), ((), ()))
        gram = lax.dot_general(hn, hn, dn, preferred_element_type=jnp.float32)
        w = wedge_ref[...]
        cnt = jnp.maximum(_sum11(w), 1.0)
        edge_loss_ref[...] = -(_sum11(w * gram) / cnt + 1e-15)
    return kernel


def run_recon_edge_loss(params, h_all, adj_bf16, x, nmask, w_edge, alpha):
    n = x.shape[0]
    return pl.pallas_call(
        _make_recon_edge_kernel(alpha, n),
        in_specs=[_VMEM] * 8,
        out_specs=(_VMEM, _VMEM),
        out_shape=(jax.ShapeDtypeStruct((1, 1), jnp.float32),
                   jax.ShapeDtypeStruct((1, 1), jnp.float32)),
        compiler_params=pltpu.CompilerParams(vmem_limit_bytes=_VMEM_LIMIT),
    )(h_all, params["e2d_w"], adj_bf16, params["dec_w"], params["dec_b"], x,
      nmask, w_edge)


# ----------------------------------------------------------------------------
# K3: loss tail — projection + streamed bidirectional semi_loss + projector
#     (Linear+BN+PReLU+Linear, per-branch batch stats) + VICReg std + Barlow cov
# ----------------------------------------------------------------------------
def _make_loss_tail_kernel(n, key_block):
    def kernel(hall_ref, fc1w_ref, fc1b_ref, fc2w_ref, fc2b_ref,
               p1w_ref, p1b_ref, g_ref, be_ref, p2w_ref, pp_ref,
               sim_ref, std_ref, cov_ref):
        hall = hall_ref[...]                       # (2N, H): [node rows ; edge rows]
        feat = hall.shape[-1]
        encn = hall[:n]                            # enc_rep_node
        ence = hall[n:]                            # enc_rep_edge

        # ---- projection: fc1 -> ELU -> fc2 (dropout identity) ----------------
        t = jnp.dot(hall.astype(_BF16), fc1w_ref[...].astype(_BF16),
                    preferred_element_type=jnp.float32) + fc1b_ref[...]
        t = jnp.where(t > 0, t, jnp.exp(jnp.minimum(t, 0.0)) - 1.0)   # ELU
        z = jnp.dot(t.astype(_BF16), fc2w_ref[...].astype(_BF16),
                    preferred_element_type=jnp.float32) + fc2b_ref[...]
        h1 = z[:n]                                 # projection(enc_rep_node)
        h2 = z[n:]                                 # projection(enc_rep_edge)

        # ---- GRACE semi_loss, both directions, streamed over key blocks ------
        z1n = _l2norm_rows(h1)
        z2n = _l2norm_rows(h2)
        z1b = z1n.astype(_BF16)
        z2b = z2n.astype(_BF16)
        dn = (((1,), (1,)), ((), ()))              # contract feature dims
        diag_const = math.exp(1.0 / _TAU)          # exp(diag(refl)/tau), unit rows
        log_diag_b = jnp.sum(z1n * z2n, axis=-1, keepdims=True) / _TAU   # (N,1)

        rs11 = jnp.zeros((n, 1), jnp.float32)      # rowsum exp(z1 z1^T / tau)
        rsb = jnp.zeros((n, 1), jnp.float32)       # rowsum exp(z1 z2^T / tau)
        cs22_blocks = []                           # colsum exp(z2 z2^T / tau)
        csb_blocks = []                            # colsum exp(z1 z2^T / tau)
        # TODO(synk): at large N move this static key-block loop onto a grid /
        # fori_loop axis (flash-style) so blocks pipeline and live ranges shrink.
        for k0 in range(0, n, key_block):
            z1k = z1b[k0:k0 + key_block]
            z2k = z2b[k0:k0 + key_block]
            r11 = jnp.exp(lax.dot_general(z1b, z1k, dn,
                                          preferred_element_type=jnp.float32) / _TAU)
            r22 = jnp.exp(lax.dot_general(z2b, z2k, dn,
                                          preferred_element_type=jnp.float32) / _TAU)
            b12 = jnp.exp(lax.dot_general(z1b, z2k, dn,
                                          preferred_element_type=jnp.float32) / _TAU)
            rs11 = rs11 + jnp.sum(r11, axis=-1, keepdims=True)
            rsb = rsb + jnp.sum(b12, axis=-1, keepdims=True)
            cs22_blocks.append(jnp.sum(r22, axis=0, keepdims=True))
            csb_blocks.append(jnp.sum(b12, axis=0, keepdims=True))
        cs22 = jnp.concatenate(cs22_blocks, axis=1)     # (1,N) rowsum==colsum (sym)
        csb = jnp.concatenate(csb_blocks, axis=1)       # (1,N) colsum(b12)=rowsum(b21)
        den1 = rs11 + rsb - diag_const                  # (N,1)
        den2 = cs22 + csb - diag_const                  # (1,N)
        sum_log_diag = _sum11(log_diag_b)
        sum_l1 = _sum11(jnp.log(den1)) - sum_log_diag
        sum_l2 = _sum11(jnp.log(den2)) - sum_log_diag
        sim_ref[...] = (sum_l1 + sum_l2) * (0.5 / n)

        # ---- projector: Linear -> BatchNorm1d (per-branch batch stats) ->
        #      PReLU -> Linear(bias=False).  TODO(synk): BN uses training-mode
        #      batch stats while dropout is identity; matches the torch module
        #      in train() with layer_dropout=0.
        y = jnp.dot(hall.astype(_BF16), p1w_ref[...].astype(_BF16),
                    preferred_element_type=jnp.float32) + p1b_ref[...]
        d1 = y.shape[-1]
        ps = pp_ref[0, 0]
        y3 = y.reshape(2, n, d1)                   # branch axis; no concat needed
        mu = jnp.mean(y3, axis=1, keepdims=True)
        var = jnp.mean((y3 - mu) * (y3 - mu), axis=1, keepdims=True)
        yn = g_ref[...] * (y3 - mu) * lax.rsqrt(var + 1e-5) + be_ref[...]
        a3 = jnp.where(yn > 0, yn, ps * yn)        # PReLU
        p_all = jnp.dot(a3.reshape(2 * n, d1).astype(_BF16),
                        p2w_ref[...].astype(_BF16),
                        preferred_element_type=jnp.float32)
        node_p = p_all[:n]                         # projector(enc_rep_node)
        edge_p = p_all[n:]                         # projector(enc_rep_edge)
        d2 = p_all.shape[-1]

        # ---- VICReg std loss (torch.var default ddof=1) ------------------------
        def colstd(v):
            m = jnp.mean(v, axis=0, keepdims=True)
            return jnp.sqrt(jnp.sum((v - m) * (v - m), axis=0, keepdims=True)
                            / (n - 1) + 1e-15)

        std_x = colstd(edge_p)
        std_y = colstd(node_p)
        std_ref[...] = (_sum11(jnp.maximum(1.0 - std_x, 0.0)) +
                        _sum11(jnp.maximum(1.0 - std_y, 0.0))) / (2.0 * d2)

        # ---- Barlow-Twins cross-correlation loss -------------------------------
        def standardize_cols(v):
            m = jnp.mean(v, axis=0, keepdims=True)
            sd = jnp.sqrt(jnp.sum((v - m) * (v - m), axis=0, keepdims=True) / (n - 1))
            return (v - m) * pl.reciprocal(sd + 1e-15, approx=True)

        z1c = standardize_cols(ence)               # enc_rep_edge_n
        z2c = standardize_cols(encn)               # enc_rep_node_n
        dn0 = (((0,), (0,)), ((), ()))             # contract node dims
        c = lax.dot_general(z1c.astype(_BF16), z2c.astype(_BF16), dn0,
                            preferred_element_type=jnp.float32) / n
        row = lax.broadcasted_iota(jnp.int32, (feat, feat), 0)
        col = lax.broadcasted_iota(jnp.int32, (feat, feat), 1)
        eye = (row == col).astype(jnp.float32)
        cd = c * eye
        trace = _sum11(cd)
        sum_diag_sq = _sum11(cd * cd)
        sum_all_sq = _sum11(c * c)
        lam = 1.0 / feat
        cov_ref[...] = ((feat - 2.0 * trace + sum_diag_sq) / d2 +
                        lam * (sum_all_sq - sum_diag_sq) / d2)
    return kernel


def run_loss_tail(params, h_all):
    n = h_all.shape[0] // 2
    kb = min(n, 512)
    return pl.pallas_call(
        _make_loss_tail_kernel(n, kb),
        in_specs=[_VMEM] * 10 + [_SMEM],
        out_specs=(_VMEM, _VMEM, _VMEM),
        out_shape=(jax.ShapeDtypeStruct((1, 1), jnp.float32),
                   jax.ShapeDtypeStruct((1, 1), jnp.float32),
                   jax.ShapeDtypeStruct((1, 1), jnp.float32)),
        compiler_params=pltpu.CompilerParams(vmem_limit_bytes=_VMEM_LIMIT),
    )(h_all, params["fc1_w"], params["fc1_b"], params["fc2_w"], params["fc2_b"],
      params["proj1_w"], params["proj1_b"], params["proj1_gamma"],
      params["proj1_beta"], params["proj2_w"], params["proj1_p"])


# ----------------------------------------------------------------------------
# Parameters (deterministic synthetic init, xavier_normal gain=1.414)
# ----------------------------------------------------------------------------
def init_params(key, in_dim, num_hidden, num_proj_hidden, proj_dims):
    ks = jax.random.split(key, 8)

    def xn(k, shape, gain=1.414):
        std = gain * math.sqrt(2.0 / (shape[0] + shape[1]))
        return (std * jax.random.normal(k, shape)).astype(jnp.float32)

    return {
        "enc_w1": xn(ks[0], (in_dim, num_hidden)),
        "enc_b1": jnp.zeros((1, num_hidden), jnp.float32),
        "enc_p1": jnp.full((1, 1), 0.25, jnp.float32),
        "enc_w2": xn(ks[1], (num_hidden, num_hidden)),
        "enc_b2": jnp.zeros((1, num_hidden), jnp.float32),
        "enc_p2": jnp.full((1, 1), 0.25, jnp.float32),
        "dec_w": xn(ks[2], (num_hidden, in_dim)),
        "dec_b": jnp.zeros((1, in_dim), jnp.float32),
        "e2d_w": xn(ks[3], (num_hidden, num_hidden)),          # bias=False
        "fc1_w": xn(ks[4], (num_hidden, num_proj_hidden)),
        "fc1_b": jnp.zeros((1, num_proj_hidden), jnp.float32),
        "fc2_w": xn(ks[5], (num_proj_hidden, num_hidden)),
        "fc2_b": jnp.zeros((1, num_hidden), jnp.float32),
        "proj1_w": xn(ks[6], (proj_dims[0], proj_dims[1])),
        "proj1_b": jnp.zeros((1, proj_dims[1]), jnp.float32),
        "proj1_gamma": jnp.ones((1, proj_dims[1]), jnp.float32),
        "proj1_beta": jnp.zeros((1, proj_dims[1]), jnp.float32),
        "proj1_p": jnp.full((1, 1), 0.25, jnp.float32),
        "proj2_w": xn(ks[7], (proj_dims[1], proj_dims[2])),    # bias=False
        "enc_mask_token": jnp.zeros((1, in_dim), jnp.float32),
    }


# ----------------------------------------------------------------------------
# JAX glue: normalized dense adjacency from an edge list
# ----------------------------------------------------------------------------
def _normalized_adj(edges_src, edges_dst, edge_weight, n):
    a = jnp.zeros((n, n), jnp.float32).at[edges_dst, edges_src].add(edge_weight)
    a = a + jnp.eye(n, dtype=jnp.float32)           # add_self_loop
    deg = jnp.clip(a.sum(axis=1), 1.0, None)
    dinv = 1.0 / jnp.sqrt(deg)
    return dinv[:, None] * a * dinv[None, :]


# ----------------------------------------------------------------------------
# Forward pass (mask_attr_prediction)
# ----------------------------------------------------------------------------
def premodel_forward(params, adj_g, edges_src, edges_dst, x,
                     epoch, args, mask_prob, mask_prob_edge, key):
    N, _ = x.shape
    E = edges_src.shape[0]
    alpha_adv = args["alpha_0"] + (epoch / args["max_epoch"]) ** args["gamma"] * \
        (args["alpha_T"] - args["alpha_0"])

    k_node, k_edge = jax.random.split(key)

    # --- encoding_mask_noise (replace_rate = 0; boolean masks, static shapes) ---
    kn1, kn2 = jax.random.split(k_node)
    perm = jax.random.permutation(kn1, N)
    num_rand_mask = int(args["mask_rate"] * N * (1.0 - alpha_adv))
    random_mask = jnp.zeros((N,), bool).at[perm[:num_rand_mask]].set(True)
    mask_ = mask_prob[:, 1]
    perm_adv = jax.random.permutation(kn2, N)
    mask_ = mask_.at[perm_adv[: int(N * (1.0 - alpha_adv))]].set(1.0)
    mask_nodes = random_mask | (mask_ != 1.0)
    use_x = x * mask_[:, None]
    use_x = jnp.where(mask_nodes[:, None], 0.0, use_x)
    use_x = use_x + jnp.where(mask_nodes[:, None], params["enc_mask_token"], 0.0)

    # --- mask_edge (simplified vs torch randperm/intersect1d/unique) ---
    # TODO(synk): keep/mask edge-set bookkeeping simplified vs the reference.
    ke1, ke2 = jax.random.split(k_edge)
    perm_e = jax.random.permutation(ke1, E)
    num_rand_mask_e = int(args["drop_edge_rate"] * E * (1.0 - alpha_adv))
    random_mask_e = jnp.zeros((E,), bool).at[perm_e[:num_rand_mask_e]].set(True)
    mask_e = mask_prob_edge[:, 1]
    perm_adv_e = jax.random.permutation(ke2, E)
    mask_e = mask_e.at[perm_adv_e[: int(E * (1.0 - alpha_adv))]].set(1.0)
    mask_edges = random_mask_e | (mask_e != 1.0)
    keep_edges = (~random_mask_e) & (mask_e != 0.0)
    adj_use = _normalized_adj(edges_src, edges_dst, keep_edges.astype(jnp.float32), N)

    # --- K1: two NxN branches (no block-diag), bf16 operands, parallel grid ---
    a_stack = jnp.stack([adj_g, adj_use], axis=0).astype(_BF16)   # (2,N,N) bf16
    x_stack = jnp.stack([use_x, x], axis=0).astype(_BF16)         # (2,N,F) bf16
    h_all = run_encoder(params, a_stack, x_stack)                 # (2N, H) f32
    # TODO(synk): enc_rep_*_n (encoder-internal aux output) identified with the
    # final hidden state, as in the dense-GCN configuration realised here.

    # --- K2: e2d + mask + GCN decoder + SCE node loss + masked-edge cos loss ---
    # edge gathers replaced by a scatter-added (N,N) masked-edge weight matrix.
    w_edge = jnp.zeros((N, N), jnp.float32).at[edges_src, edges_dst].add(
        mask_edges.astype(jnp.float32))
    nmask = mask_nodes.astype(jnp.float32)[:, None]
    node_loss11, pos_loss11 = run_recon_edge_loss(
        params, h_all, a_stack[0], x, nmask, w_edge, args["alpha_l"])
    node_loss = node_loss11[0, 0]
    edge_loss = pos_loss11[0, 0]                                  # = pos_loss

    num_all_nodes = mask_prob[:, 1].sum() + mask_prob[:, 0].sum()
    loss_mask = node_loss + args["belta"] * (
        1.0 / jnp.sin(jnp.pi / num_all_nodes * mask_prob[:, 0].sum()))
    num_all_edges = mask_prob_edge[:, 1].sum() + mask_prob_edge[:, 0].sum()
    loss_mask_edge = -edge_loss + args["belta_edge"] * (
        1.0 / jnp.sin(jnp.pi / num_all_edges * mask_prob_edge[:, 0].sum()))

    # --- K3: projection + semi_loss (both dirs, streamed) + projector + std + cov
    sim11, std11, cov11 = run_loss_tail(params, h_all)
    loss = (args["std"] * std11[0, 0] + args["sim"] * sim11[0, 0] +
            args["cov"] * cov11[0, 0])
    return loss, loss_mask, loss_mask_edge


# ----------------------------------------------------------------------------
if __name__ == "__main__":
    N, E = 64, 256
    in_dim, num_hidden, num_proj_hidden = 32, 64, 128
    proj_dims = [num_hidden, 64, 64]          # mlp = '64-64', embedding = num_hidden

    key = jax.random.PRNGKey(0)
    k_x, k_e, k_mp, k_mpe, k_par, k_fwd = jax.random.split(key, 6)
    x = jax.random.normal(k_x, (N, in_dim), jnp.float32)
    ke1, ke2 = jax.random.split(k_e)
    edges_src = jax.random.randint(ke1, (E,), 0, N)
    edges_dst = jax.random.randint(ke2, (E,), 0, N)
    mask_prob = jax.nn.softmax(jax.random.normal(k_mp, (N, 2)), axis=-1)
    mask_prob_edge = jax.nn.softmax(jax.random.normal(k_mpe, (E, 2)), axis=-1)

    adj_g = _normalized_adj(edges_src, edges_dst, jnp.ones((E,), jnp.float32), N)
    params = init_params(k_par, in_dim, num_hidden, num_proj_hidden, proj_dims)

    args = dict(alpha_0=0.0, alpha_T=1.0, gamma=2.0, max_epoch=10,
                belta=0.1, belta_edge=0.1, std=1.0, sim=1.0, cov=1.0,
                mask_rate=0.3, drop_edge_rate=0.2, alpha_l=2.0, layer_dropout=0.0)
    epoch = 3

    loss, loss_mask, loss_mask_edge = premodel_forward(
        params, adj_g, edges_src, edges_dst, x, epoch, args,
        mask_prob, mask_prob_edge, k_fwd)
    jax.block_until_ready((loss, loss_mask, loss_mask_edge))
    loss_item = {"loss": float(loss)}
    print("KERNEL_OK")
</pallas_src>

<mosaic_0001>
module attributes {stable_mosaic.version = 11 : i64} {
  func.func @_encoder_kernel(%arg0: i32, %arg1: memref<1x64x64xbf16, #tpu.memory_space<vmem>>, %arg2: memref<1x64x32xbf16, #tpu.memory_space<vmem>>, %arg3: memref<32x64xf32, #tpu.memory_space<vmem>>, %arg4: memref<1x64xf32, #tpu.memory_space<vmem>>, %arg5: memref<64x64xf32, #tpu.memory_space<vmem>>, %arg6: memref<1x64xf32, #tpu.memory_space<vmem>>, %arg7: memref<1x1xf32, #tpu.memory_space<smem>>, %arg8: memref<1x1xf32, #tpu.memory_space<smem>>, %arg9: memref<64x64xf32, #tpu.memory_space<vmem>>) attributes {dimension_semantics = [#tpu.dimension_semantics<parallel>], iteration_bounds = array<i64: 2>, scalar_prefetch = 0 : i64, scratch_operands = 0 : i64, tpu.core_type = #tpu.core_type<tc>, window_params = [{transform_indices = @transform_0, window_bounds = array<i64: 1, 64, 64>}, {transform_indices = @transform_1, window_bounds = array<i64: 1, 64, 32>}, {pipeline_mode = #tpu.pipeline_mode<synchronous>, transform_indices = @transform_2, window_bounds = array<i64: 32, 64>}, {pipeline_mode = #tpu.pipeline_mode<synchronous>, transform_indices = @transform_3, window_bounds = array<i64: 1, 64>}, {pipeline_mode = #tpu.pipeline_mode<synchronous>, transform_indices = @transform_4, window_bounds = array<i64: 64, 64>}, {pipeline_mode = #tpu.pipeline_mode<synchronous>, transform_indices = @transform_5, window_bounds = array<i64: 1, 64>}, {transform_indices = @transform_6, window_bounds = array<i64: 1, 1>}, {transform_indices = @transform_7, window_bounds = array<i64: 1, 1>}, {transform_indices = @transform_8, window_bounds = array<i64: 64, 64>}]} {
    %c0 = arith.constant 0 : index
    %c0_0 = arith.constant 0 : index
    %c0_1 = arith.constant 0 : index
    %0 = vector.load %arg1[%c0, %c0_0, %c0_1] : memref<1x64x64xbf16, #tpu.memory_space<vmem>>, vector<1x64x64xbf16>
    %1 = vector.shape_cast %0 : vector<1x64x64xbf16> to vector<64x64xbf16>
    %c0_2 = arith.constant 0 : index
    %c0_3 = arith.constant 0 : index
    %c0_4 = arith.constant 0 : index
    %2 = vector.load %arg2[%c0_2, %c0_3, %c0_4] : memref<1x64x32xbf16, #tpu.memory_space<vmem>>, vector<1x64x32xbf16>
    %3 = vector.shape_cast %2 : vector<1x64x32xbf16> to vector<64x32xbf16>
    %c0_5 = arith.constant 0 : index
    %c0_6 = arith.constant 0 : index
    %4 = vector.load %arg3[%c0_5, %c0_6] : memref<32x64xf32, #tpu.memory_space<vmem>>, vector<32x64xf32>
    %5 = arith.truncf %4 : vector<32x64xf32> to vector<32x64xbf16>
    %cst = arith.constant dense<0.000000e+00> : vector<64x64xf32>
    %6 = tpu.matmul %3, %5, %cst {dimension_numbers = #tpu.dot_dimension_numbers<[1], [0], [0], [1], [0, 0, 1, 1], [], []>} : vector<64x32xbf16>, vector<32x64xbf16>, vector<64x64xf32> -> vector<64x64xf32>
    %7 = arith.truncf %6 : vector<64x64xf32> to vector<64x64xbf16>
    %cst_7 = arith.constant dense<0.000000e+00> : vector<64x64xf32>
    %8 = tpu.matmul %1, %7, %cst_7 {dimension_numbers = #tpu.dot_dimension_numbers<[1], [0], [0], [1], [0, 0, 1, 1], [], []>} : vector<64x64xbf16>, vector<64x64xbf16>, vector<64x64xf32> -> vector<64x64xf32>
    %c0_8 = arith.constant 0 : index
    %c0_9 = arith.constant 0 : index
    %9 = vector.load %arg4[%c0_8, %c0_9] : memref<1x64xf32, #tpu.memory_space<vmem>>, vector<1x64xf32>
    %10 = vector.broadcast %9 : vector<1x64xf32> to vector<64x64xf32>
    %11 = arith.addf %8, %10 : vector<64x64xf32>
    %c0_10 = arith.constant 0 : index
    %c0_11 = arith.constant 0 : index
    %12 = memref.load %arg7[%c0_10, %c0_11] : memref<1x1xf32, #tpu.memory_space<smem>>
    %cst_12 = arith.constant 0.000000e+00 : f32
    %13 = vector.broadcast %cst_12 : f32 to vector<64x64xf32>
    %14 = arith.cmpf ogt, %11, %13 : vector<64x64xf32>
    %15 = vector.broadcast %12 : f32 to vector<64x64xf32>
    %16 = arith.mulf %15, %11 : vector<64x64xf32>
    %17 = arith.select %14, %11, %16 : vector<64x64xi1>, vector<64x64xf32>
    %18 = arith.truncf %17 : vector<64x64xf32> to vector<64x64xbf16>
    %c0_13 = arith.constant 0 : index
    %c0_14 = arith.constant 0 : index
    %19 = vector.load %arg5[%c0_13, %c0_14] : memref<64x64xf32, #tpu.memory_space<vmem>>, vector<64x64xf32>
    %20 = arith.truncf %19 : vector<64x64xf32> to vector<64x64xbf16>
    %cst_15 = arith.constant dense<0.000000e+00> : vector<64x64xf32>
    %21 = tpu.matmul %18, %20, %cst_15 {dimension_numbers = #tpu.dot_dimension_numbers<[1], [0], [0], [1], [0, 0, 1, 1], [], []>} : vector<64x64xbf16>, vector<64x64xbf16>, vector<64x64xf32> -> vector<64x64xf32>
    %22 = arith.truncf %21 : vector<64x64xf32> to vector<64x64xbf16>
    %cst_16 = arith.constant dense<0.000000e+00> : vector<64x64xf32>
    %23 = tpu.matmul %1, %22, %cst_16 {dimension_numbers = #tpu.dot_dimension_numbers<[1], [0], [0], [1], [0, 0, 1, 1], [], []>} : vector<64x64xbf16>, vector<64x64xbf16>, vector<64x64xf32> -> vector<64x64xf32>
    %c0_17 = arith.constant 0 : index
    %c0_18 = arith.constant 0 : index
    %24 = vector.load %arg6[%c0_17, %c0_18] : memref<1x64xf32, #tpu.memory_space<vmem>>, vector<1x64xf32>
    %25 = vector.broadcast %24 : vector<1x64xf32> to vector<64x64xf32>
    %26 = arith.addf %23, %25 : vector<64x64xf32>
    %c0_19 = arith.constant 0 : index
    %c0_20 = arith.constant 0 : index
    %27 = memref.load %arg8[%c0_19, %c0_20] : memref<1x1xf32, #tpu.memory_space<smem>>
    %cst_21 = arith.constant 0.000000e+00 : f32
    %28 = vector.broadcast %cst_21 : f32 to vector<64x64xf32>
    %29 = arith.cmpf ogt, %26, %28 : vector<64x64xf32>
    %30 = vector.broadcast %27 : f32 to vector<64x64xf32>
    %31 = arith.mulf %30, %26 : vector<64x64xf32>
    %32 = arith.select %29, %26, %31 : vector<64x64xi1>, vector<64x64xf32>
    %c0_22 = arith.constant 0 : index
    %c0_23 = arith.constant 0 : index
    %33 = vector.load %arg9[%c0_22, %c0_23] : memref<64x64xf32, #tpu.memory_space<vmem>>, vector<64x64xf32>
    tpu.vector_store %arg9[%c0_22, %c0_23], %32 {strides = array<i32>} : memref<64x64xf32, #tpu.memory_space<vmem>>, vector<64x64xf32>,
    return
  }
  func.func @transform_0(%arg0: i32) -> (i32, i32, i32) {
    %c0_i32 = arith.constant 0 : i32
    %c0_i32_0 = arith.constant 0 : i32
    %c0_i32_1 = arith.constant 0 : i32
    return %arg0, %c0_i32, %c0_i32_0 : i32, i32, i32
  }
  func.func @transform_1(%arg0: i32) -> (i32, i32, i32) {
    %c0_i32 = arith.constant 0 : i32
    %c0_i32_0 = arith.constant 0 : i32
    %c0_i32_1 = arith.constant 0 : i32
    return %arg0, %c0_i32, %c0_i32_0 : i32, i32, i32
  }
  func.func @transform_2(%arg0: i32) -> (i32, i32) {
    %c0_i32 = arith.constant 0 : i32
    %c0_i32_0 = arith.constant 0 : i32
    %c0_i32_1 = arith.constant 0 : i32
    return %c0_i32, %c0_i32_0 : i32, i32
  }
  func.func @transform_3(%arg0: i32) -> (i32, i32) {
    %c0_i32 = arith.constant 0 : i32
    %c0_i32_0 = arith.constant 0 : i32
    %c0_i32_1 = arith.constant 0 : i32
    return %c0_i32, %c0_i32_0 : i32, i32
  }
  func.func @transform_4(%arg0: i32) -> (i32, i32) {
    %c0_i32 = arith.constant 0 : i32
    %c0_i32_0 = arith.constant 0 : i32
    %c0_i32_1 = arith.constant 0 : i32
    return %c0_i32, %c0_i32_0 : i32, i32
  }
  func.func @transform_5(%arg0: i32) -> (i32, i32) {
    %c0_i32 = arith.constant 0 : i32
    %c0_i32_0 = arith.constant 0 : i32
    %c0_i32_1 = arith.constant 0 : i32
    return %c0_i32, %c0_i32_0 : i32, i32
  }
  func.func @transform_6(%arg0: i32) -> (i32, i32) {
    %c0_i32 = arith.constant 0 : i32
    %c0_i32_0 = arith.constant 0 : i32
    %c0_i32_1 = arith.constant 0 : i32
    return %c0_i32, %c0_i32_0 : i32, i32
  }
  func.func @transform_7(%arg0: i32) -> (i32, i32) {
    %c0_i32 = arith.constant 0 : i32
    %c0_i32_0 = arith.constant 0 : i32
    %c0_i32_1 = arith.constant 0 : i32
    return %c0_i32, %c0_i32_0 : i32, i32
  }
  func.func @transform_8(%arg0: i32) -> (i32, i32) {
    %c0_i32 = arith.constant 0 : i32
    %c0_i32_0 = arith.constant 0 : i32
    return %arg0, %c0_i32 : i32, i32
  }
}

</mosaic_0001>

<bundles_post_ra>
// kernel: tpu_custom_call.1
= control target key start
LH: loop header
LB: loop body
LE: loop exit
PB: predicated region body
PF: predicated region fallthrough
CT: control target
= control target key end

     0   :  { %s1246_s0 = inlined_call_operand.vmem [shape: bf16[2,64,64], index: 0, kind: input, shape index: {}]   ;;  %s1247_s1 = inlined_call_operand.vmem [shape: bf16[2,64,32], index: 1, kind: input, shape index: {}]   ;;  %s1248_s2 = inlined_call_operand.vmem [shape: f32[32,64], index: 2, kind: input, shape index: {}]   ;;  %s1249_s3 = inlined_call_operand.vmem [shape: f32[1,64], index: 3, kind: input, shape index: {}]   ;;  %s1250_s4 = inlined_call_operand.hbm [shape: f32[64,64], index: 4, kind: input, shape index: {}]   ;;  %s1251_s5 = inlined_call_operand.vmem [shape: f32[1,64], index: 5, kind: input, shape index: {}]   ;;  %s1252_s6 = inlined_call_operand.<no memory space> [shape: f32[1,1], index: 6, kind: input, shape index: {}]   ;;  %s1253_s7 = inlined_call_operand.<no memory space> [shape: f32[1,1], index: 7, kind: input, shape index: {}]   ;;  %s1254_s8 = inlined_call_operand.vmem [shape: f32[128,64], index: 8, kind: output, shape index: {}]  }
   0x1   :  { %13 = sst [smem:[#allocation2]] %s1252_s6 }
   0x2   :  { %14 = sst [smem:[#allocation3]] %s1253_s7 }
   0x3   :  { %15 = vsyncpa [#allocation5], 0  ;;  %s1137_s9 = smov 0  }
   0x4 LB: > { %s1143_s10 = sadd.s32 4294967295, %s1081_s9   ;;  %p885_p0 = scmp.ge.s32.totalorder %s1081_s9, 1  ;;  %s1081_s9 = sphi %s1137_s9, %s21_s9  }
   0x5   : > { %p230_p1 = scmp.lt.s32.totalorder %s1081_s9, 3  ;;  %s1083_s6 = smov [#allocation4]  }
   0x6   : > { %s248_s11 = sshll.u32 %s1083_s6, 4  ;;  %p1024_p3 = scmp.eq.s32.totalorder %s1143_s10, 0  ;;  %s249_s11 = int_to_ptr.vmem [resolvable:$true] %s248_s11 }
   0x7   : > { %p1147_p2 = pnand %p885_p0, %p230_p1  ;;  %s1056_s12 = scalar_lea.vmem %s249_s11, 1024 }
   0x8   : > { %p1057_p7 = scmp.ne.s32.totalorder %s249_s11, %s1056_s12  ;;  %p1064_p10 = scmp.lt.s32.totalorder %s249_s11, %s249_s11 }
   0x9   : > { %p1020_p4 = pneg %p1147_p2  ;;  %p1065_p11 = scmp.lt.s32.totalorder %s1056_s12, %s1056_s12 }
   0xb   : > { %p1021_p5 = pnand %p1024_p3, %p1020_p4  ;;  %p1066_p12 = por %p1065_p11, %p1064_p10 }
   0xd   : > { %p1047_p6 = pneg %p1021_p5 }
   0xf   : > { %p1059_p8 = pnand %p1057_p7, %p1047_p6 }
  0x11   : > { %p1060_p9 = pneg %p1059_p8 }
  0x13   : > { %p1067_p13 = pnand %p1066_p12, %p1060_p9 }
  0x15   : > { %1070 = shalt.err (!%p1067_p13)
}
  0x16   : > { %s1084_s13 = smov 128   ;;  %s1085_s14 = smov 8  }
  0x17   : > { %1023 = dma.hbm_to_vmem [thread:$0]  (!%p1021_p5), %s1250_s4, 1024, %s249_s11, [#allocation5], %s1084_s13, %s1084_s13, %s1085_s14  }
  0x18   : > { %289 = sbr.rel (%p1147_p2) target bundleno = 907 (0x38b), region = 52 }
  0x1d   : > { %1076 = dma.done.wait (%p1024_p3), [#allocation5], 1024  }
  0x1e   : > { %1078 = vsyncadd (%p1024_p3), [#allocation5], 4294966272  ;;  %p328_p0 = scmp.lt.s32.totalorder %s1143_s10, 1  ;;  %v363_v0 = vld [vmem:[%s1248_s2 + $0x10] sm:$0xff]  ;;  %v364_v1 = vld [vmem:[%s1248_s2 + $0x18] sm:$0xff]  ;;  %vm387_vm0 = vcmask 261120  }
  0x1f   : > { %v361_v2 = vld [vmem:[%s1248_s2] sm:$0xff]  ;;  %v366_v3 = vpack.c.bf16 %v364_v1, %v363_v0  ;;  %v362_v4 = vld [vmem:[%s1248_s2 + $0x8] sm:$0xff]  ;;  %vm496_vm1 = vcmask 523264   ;;  %v610_v11 = vld [vmem:[#allocation4 + $0x30] sm:$0xff]  ;;  %s574_s7 = sld [smem:[#allocation2]]  ;;  %s894_s14 = sshll.u32 %s1143_s10, 3 }
  0x20   : > { %s329_s17 = scalar_select %p328_p0, %s1143_s10, 1  ;;  %v365_v5 = vpack.c.bf16 %v362_v4, %v361_v2  ;;  %v611_v12 = vld [vmem:[#allocation4 + $0x38] sm:$0xff]  ;;  %v608_v29 = vld [vmem:[#allocation4 + $0x20] sm:$0xff]  ;;  %v609_v30 = vld [vmem:[#allocation4 + $0x28] sm:$0xff] }
  0x21   : > { %956 = vmatprep.subr.bf16.mxu0 %v366_v3  ;;  %v615_v13 = vpack.c.bf16 %v611_v12, %v610_v11  ;;  %v614_v31 = vpack.c.bf16 %v609_v30, %v608_v29  ;;  %v606_v32 = vld [vmem:[#allocation4 + $0x10] sm:$0xff]  ;;  %v607_v33 = vld [vmem:[#allocation4 + $0x18] sm:$0xff]  ;;  %v604_v35 = vld [vmem:[#allocation4] sm:$0xff]  ;;  %p339_p1 = scmp.lt.s32.totalorder %s894_s14, 15  ;;  %s769_s15 = sld [smem:[#allocation3]] }
  0x22   : > { %s924_s18 = sshll.u32 %s329_s17, 5  ;;  %957 = vmatpush3.bf16.msra.mxu0 %v366_v3  ;;  %v613_v34 = vpack.c.bf16 %v607_v33, %v606_v32  ;;  %v605_v36 = vld [vmem:[#allocation4 + $0x8] sm:$0xff]  ;;  %v904_v39 = vld [vmem:[%s1249_s3] ss:$0 sm:$0xff] }
  0x23   : > { %s337_s21 = scalar_lea.vmem %s1247_s1, %s924_s18  ;;  %958 = vmatprep.subr.bf16.mxu0 %v365_v5  ;;  %s1185_s11 = scalar_lea.vmem %s1246_s0, %s924_s18  ;;  %v612_v37 = vpack.c.bf16 %v605_v36, %v604_v35 }
  0x24   : > { %v1037_v6 = vld [vmem:[%s337_s21] sm:$0xff]   ;;  %v1038_v7 = vld [vmem:[%s337_s21 + $0x8] sm:$0xff]   ;;  %v1039_v8 = vld [vmem:[%s337_s21 + $0x10] sm:$0xff]   ;;  %s1257_s14 = smov (!%p339_p1, %s894_s14), 15 }
  0x25   : > { %960 = vmatprep.mubr.msk.bf16.mxu0 %vm387_vm0, %v1037_v6  ;;  %v1040_v9 = vld [vmem:[%s337_s21 + $0x18] sm:$0xff]   ;;  %v1041_v10 = vld [vmem:[%s1185_s11] sm:$0xff]   ;;  %v1190_v26 = vld [vmem:[%s1185_s11 + $0x8] sm:$0xff]   ;;  %v583_v44 = vstv %s574_s7  ;;  %s895_s18 = sshll.u32 %s1257_s14, 3 }
  0x26   : > { %959 = vmatpush3.bf16.msra.mxu0 %v365_v5  ;;  %976 = vmatprep.mubr.msk.bf16.mxu1 %vm496_vm1, %v1041_v10  ;;  %v1193_v27 = vld [vmem:[%s1185_s11 + $0x10] sm:$0xff]   ;;  %v1200_v28 = vld [vmem:[%s1185_s11 + $0x18] sm:$0xff]   ;;  %s1225_s21 = scalar_lea.vmem %s1254_s8, %s895_s18 }
  0x27   : > { %984 = vmatprep.subr.bf16.mxu0 %v615_v13  ;;  %v778_v29 = vstv %s769_s15 }
  0x29   : > { %961 = vmatmul.mubr.msk.bf16.vlgmr.msra.gmra.mxu0 %vm387_vm0, %v1038_v7 }
  0x2a   : > { %964 = vmatprep.mubr.msk.bf16.mxu0 %vm387_vm0, %v1039_v8  ;;  %985 = vmatpush3.bf16.msra.mxu0 %v615_v13 }
  0x2b   : > { %986 = vmatprep.subr.bf16.mxu0 %v614_v31 }
  0x2e   : > { %987 = vmatpush3.bf16.msra.mxu0 %v614_v31 }
  0x2f   : > { %988 = vmatprep.subr.bf16.mxu0 %v613_v34 }
  0x31   : > { %965 = vmatmul.mubr.msk.bf16.gmra.mxu0 %vm387_vm0, %v1040_v9 }
  0x32   : > { %989 = vmatpush3.bf16.msra.mxu0 %v613_v34 }
  0x33   : > { %990 = vmatprep.subr.bf16.mxu0 %v612_v37 }
  0x36   : > { %991 = vmatpush3.bf16.msra.mxu0 %v612_v37 }
  0xe9   : > { %v962_v14 = vpop.f32.mrf.mxu0 }
  0xeb   : > { %v434_v15 = vpop.f32.mrf.mxu0 }
  0xed   : > { %v963_v16 = vpop.f32.mrf.mxu0 }
  0xee   : > { %v466_v24 = vpack.c.bf16 %v963_v16, %v962_v14 }
  0xef   : > { %v437_v17 = vpop.f32.mrf.mxu0 }
  0xf0   : > { %v465_v25 = vpack.c.bf16 %v437_v17, %v434_v15 }
  0xf1   : > { %v966_v18 = vpop.f32.mrf.mxu0 }
  0xf3   : > { %v450_v19 = vpop.f32.mrf.mxu0 }
  0xf5   : > { %v967_v20 = vpop.f32.mrf.mxu0 }
  0xf6   : > { %v468_v21 = vpack.c.bf16 %v967_v20, %v966_v18 }
  0xf7   : > { %v453_v22 = vpop.f32.mrf.mxu0 }
  0xf8   : > { %v467_v23 = vpack.c.bf16 %v453_v22, %v450_v19  ;;  %968 = vmatprep.subr.bf16.mxu1 %v468_v21 }
  0xf9   : > { %969 = vmatpush3.bf16.msra.mxu1 %v468_v21 }
  0xfa   : > { %970 = vmatprep.subr.bf16.mxu1 %v467_v23 }
  0xfd   : > { %971 = vmatpush3.bf16.msra.mxu1 %v467_v23 }
  0xfe   : > { %972 = vmatprep.subr.bf16.mxu1 %v466_v24 }
 0x101   : > { %973 = vmatpush3.bf16.msra.mxu1 %v466_v24  ;;  %v917_v24 = vld [vmem:[%s1251_s5] ss:$0 sm:$0xff] }
 0x102   : > { %974 = vmatprep.subr.bf16.mxu1 %v465_v25 }
 0x105   : > { %975 = vmatpush3.bf16.msra.mxu1 %v465_v25 }
 0x108   : > { %977 = vmatmul.mubr.msk.bf16.vlgmr.msra.gmra.mxu1 %vm496_vm1, %v1190_v26 }
 0x109   : > { %980 = vmatprep.mubr.msk.bf16.mxu1 %vm496_vm1, %v1193_v27 }
 0x110   : > { %981 = vmatmul.mubr.msk.bf16.gmra.mxu1 %vm496_vm1, %v1200_v28 }
 0x111   : > { %1008 = vmatprep.mubr.msk.bf16.mxu1 %vm496_vm1, %v1041_v10 }
 0x1c8   : > { %v978_v38 = vpop.f32.mrf.mxu1 }
 0x1c9   : > { %v552_v42 = vadd.f32 %v978_v38, %v904_v39 }
 0x1ca   : > { %v543_v40 = vpop.f32.mrf.mxu1 }
 0x1cb   : > { %v544_v41 = vadd.f32 %v904_v39, %v543_v40  ;;  %v586_v50 = vmul.f32 %v583_v44, %v552_v42  ;;  %vm577_vm4 = vcmp.gt.f32.partialorder %v552_v42, 0.0 }
 0x1cc   : > { %v979_v43 = vpop.f32.mrf.mxu1 }
 0x1cd   : > { %v555_v45 = vadd.f32 %v979_v43, %v904_v39  ;;  %v584_v47 = vmul.f32 %v583_v44, %v544_v41  ;;  %vm575_vm3 = vcmp.gt.f32.partialorder %v544_v41, 0.0  ;;  %v594_v58 = vsel %vm577_vm4, %v552_v42, %v586_v50 }
 0x1ce   : > { %v546_v46 = vpop.f32.mrf.mxu1 }
 0x1cf   : > { %vm578_vm2 = vcmp.gt.f32.partialorder %v555_v45, 0.0  ;;  %v587_v48 = vmul.f32 %v583_v44, %v555_v45  ;;  %v547_v49 = vadd.f32 %v904_v39, %v546_v46  ;;  %v592_v55 = vsel %vm575_vm3, %v544_v41, %v584_v47 }
 0x1d0   : > { %v982_v51 = vpop.f32.mrf.mxu1 }
 0x1d1   : > { %vm576_vm5 = vcmp.gt.f32.partialorder %v547_v49, 0.0  ;;  %v585_v52 = vmul.f32 %v583_v44, %v547_v49  ;;  %v595_v53 = vsel %vm578_vm2, %v555_v45, %v587_v48  ;;  %v568_v60 = vadd.f32 %v982_v51, %v904_v39 }
 0x1d2   : > { %v559_v54 = vpop.f32.mrf.mxu1  ;;  %v601_v62 = vpack.c.bf16 %v595_v53, %v594_v58 }
 0x1d3   : > { %v593_v56 = vsel %vm576_vm5, %v547_v49, %v585_v52  ;;  %v560_v57 = vadd.f32 %v904_v39, %v559_v54  ;;  %v590_v4 = vmul.f32 %v583_v44, %v568_v60  ;;  %vm581_vm8 = vcmp.gt.f32.partialorder %v568_v60, 0.0 }
 0x1d4   : > { %v600_v59 = vpack.c.bf16 %v593_v56, %v592_v55  ;;  %v983_v61 = vpop.f32.mrf.mxu1 }
 0x1d5   : > { %v571_v63 = vadd.f32 %v983_v61, %v904_v39  ;;  %v588_v1 = vmul.f32 %v583_v44, %v560_v57  ;;  %vm579_vm7 = vcmp.gt.f32.partialorder %v560_v57, 0.0  ;;  %v598_v9 = vsel %vm581_vm8, %v568_v60, %v590_v4 }
 0x1d6   : > { %v562_v0 = vpop.f32.mrf.mxu1  ;;  %992 = vmatprep.mubr.msk.bf16.mxu0 %vm496_vm1, %v600_v59 }
 0x1d7   : > { %vm582_vm6 = vcmp.gt.f32.partialorder %v571_v63, 0.0  ;;  %v591_v2 = vmul.f32 %v583_v44, %v571_v63  ;;  %v563_v3 = vadd.f32 %v904_v39, %v562_v0  ;;  %993 = vmatmul.mubr.msk.bf16.vlgmr.msra.gmra.mxu0 %vm496_vm1, %v601_v62  ;;  %v596_v7 = vsel %vm579_vm7, %v560_v57, %v588_v1 }
 0x1d9   : > { %vm580_vm9 = vcmp.gt.f32.partialorder %v563_v3, 0.0  ;;  %v589_v5 = vmul.f32 %v583_v44, %v563_v3  ;;  %v599_v6 = vsel %vm582_vm6, %v571_v63, %v591_v2 }
 0x1da   : > { %v603_v11 = vpack.c.bf16 %v599_v6, %v598_v9 }
 0x1db   : > { %v597_v8 = vsel %vm580_vm9, %v563_v3, %v589_v5 }
 0x1dc   : > { %v602_v10 = vpack.c.bf16 %v597_v8, %v596_v7 }
 0x1de   : > { %996 = vmatprep.mubr.msk.bf16.mxu0 %vm496_vm1, %v602_v10 }
 0x1df   : > { %997 = vmatmul.mubr.msk.bf16.gmra.mxu0 %vm496_vm1, %v603_v11 }
 0x297   : > { %v994_v12 = vpop.f32.mrf.mxu0 }
 0x299   : > { %v662_v13 = vpop.f32.mrf.mxu0 }
 0x29b   : > { %v995_v14 = vpop.f32.mrf.mxu0 }
 0x29c   : > { %v694_v22 = vpack.c.bf16 %v995_v14, %v994_v12 }
 0x29d   : > { %v665_v15 = vpop.f32.mrf.mxu0 }
 0x29e   : > { %v693_v23 = vpack.c.bf16 %v665_v15, %v662_v13 }
 0x29f   : > { %v998_v16 = vpop.f32.mrf.mxu0 }
 0x2a1   : > { %v678_v17 = vpop.f32.mrf.mxu0 }
 0x2a3   : > { %v999_v18 = vpop.f32.mrf.mxu0 }
 0x2a4   : > { %v696_v19 = vpack.c.bf16 %v999_v18, %v998_v16 }
 0x2a5   : > { %v681_v20 = vpop.f32.mrf.mxu0 }
 0x2a6   : > { %v695_v21 = vpack.c.bf16 %v681_v20, %v678_v17  ;;  %1000 = vmatprep.subr.bf16.mxu1 %v696_v19 }
 0x2a7   : > { %1001 = vmatpush3.bf16.msra.mxu1 %v696_v19 }
 0x2a8   : > { %1002 = vmatprep.subr.bf16.mxu1 %v695_v21 }
 0x2ab   : > { %1003 = vmatpush3.bf16.msra.mxu1 %v695_v21 }
 0x2ac   : > { %1004 = vmatprep.subr.bf16.mxu1 %v694_v22 }
 0x2af   : > { %1005 = vmatpush3.bf16.msra.mxu1 %v694_v22 }
 0x2b0   : > { %1006 = vmatprep.subr.bf16.mxu1 %v693_v23 }
 0x2b3   : > { %1007 = vmatpush3.bf16.msra.mxu1 %v693_v23 }
 0x2b6   : > { %1009 = vmatmul.mubr.msk.bf16.vlgmr.msra.gmra.mxu1 %vm496_vm1, %v1190_v26 }
 0x2b7   : > { %1012 = vmatprep.mubr.msk.bf16.mxu1 %vm496_vm1, %v1193_v27 }
 0x2be   : > { %1013 = vmatmul.mubr.msk.bf16.gmra.mxu1 %vm496_vm1, %v1200_v28 }
 0x376   : > { %v1010_v25 = vpop.f32.mrf.mxu1 }
 0x377   : > { %v747_v30 = vadd.f32 %v1010_v25, %v917_v24 }
 0x378   : > { %v738_v31 = vpop.f32.mrf.mxu1 }
 0x379   : > { %vm772_vm10 = vcmp.gt.f32.partialorder %v747_v30, 0.0  ;;  %v781_v26 = vmul.f32 %v778_v29, %v747_v30  ;;  %v739_v27 = vadd.f32 %v917_v24, %v738_v31 }
 0x37a   : > { %v1011_v28 = vpop.f32.mrf.mxu1 }
 0x37b   : > { %v789_v32 = vsel %vm772_vm10, %v747_v30, %v781_v26  ;;  %vm770_vm11 = vcmp.gt.f32.partialorder %v739_v27, 0.0  ;;  %v779_v33 = vmul.f32 %v778_v29, %v739_v27  ;;  %v750_v34 = vadd.f32 %v1011_v28, %v917_v24 }
 0x37c   : > { %797 = vst.msk [vmem:[%s1225_s21 + $0x10] sm:$0xff] %vm496_vm1, %v789_v32  ;;  %v741_v35 = vpop.f32.mrf.mxu1 }
 0x37d   : > { %v787_v36 = vsel %vm770_vm11, %v739_v27, %v779_v33  ;;  %vm773_vm12 = vcmp.gt.f32.partialorder %v750_v34, 0.0  ;;  %v782_v37 = vmul.f32 %v778_v29, %v750_v34  ;;  %v742_v38 = vadd.f32 %v917_v24, %v741_v35 }
 0x37e   : > { %795 = vst.msk [vmem:[%s1225_s21] sm:$0xff] %vm496_vm1, %v787_v36  ;;  %v1014_v39 = vpop.f32.mrf.mxu1 }
 0x37f   : > { %v790_v40 = vsel %vm773_vm12, %v750_v34, %v782_v37  ;;  %vm771_vm13 = vcmp.gt.f32.partialorder %v742_v38, 0.0  ;;  %v780_v41 = vmul.f32 %v778_v29, %v742_v38  ;;  %v763_v42 = vadd.f32 %v1014_v39, %v917_v24 }
 0x380   : > { %798 = vst.msk [vmem:[%s1225_s21 + $0x18] sm:$0xff] %vm496_vm1, %v790_v40  ;;  %v754_v43 = vpop.f32.mrf.mxu1 }
 0x381   : > { %v788_v44 = vsel %vm771_vm13, %v742_v38, %v780_v41  ;;  %vm776_vm14 = vcmp.gt.f32.partialorder %v763_v42, 0.0  ;;  %v785_v45 = vmul.f32 %v778_v29, %v763_v42  ;;  %v755_v46 = vadd.f32 %v917_v24, %v754_v43 }
 0x382   : > { %796 = vst.msk [vmem:[%s1225_s21 + $0x8] sm:$0xff] %vm496_vm1, %v788_v44  ;;  %v1015_v47 = vpop.f32.mrf.mxu1 }
 0x383   : > { %v793_v48 = vsel %vm776_vm14, %v763_v42, %v785_v45  ;;  %vm774_vm15 = vcmp.gt.f32.partialorder %v755_v46, 0.0  ;;  %v783_v49 = vmul.f32 %v778_v29, %v755_v46  ;;  %v766_v50 = vadd.f32 %v1015_v47, %v917_v24 }
 0x384   : > { %801 = vst.msk [vmem:[%s1225_s21 + $0x30] sm:$0xff] %vm496_vm1, %v793_v48  ;;  %v757_v51 = vpop.f32.mrf.mxu1 }
 0x385   : > { %v791_v52 = vsel %vm774_vm15, %v755_v46, %v783_v49  ;;  %vm777_vm0 = vcmp.gt.f32.partialorder %v766_v50, 0.0  ;;  %v786_v53 = vmul.f32 %v778_v29, %v766_v50  ;;  %v758_v54 = vadd.f32 %v917_v24, %v757_v51 }
 0x386   : > { %799 = vst.msk [vmem:[%s1225_s21 + $0x20] sm:$0xff] %vm496_vm1, %v791_v52 }
 0x387   : > { %v794_v55 = vsel %vm777_vm0, %v766_v50, %v786_v53  ;;  %vm775_vm2 = vcmp.gt.f32.partialorder %v758_v54, 0.0  ;;  %v784_v56 = vmul.f32 %v778_v29, %v758_v54 }
 0x388   : > { %802 = vst.msk [vmem:[%s1225_s21 + $0x38] sm:$0xff] %vm496_vm1, %v794_v55 }
 0x389   : > { %v792_v57 = vsel %vm775_vm2, %v758_v54, %v784_v56 }
 0x38a   : > { %800 = vst.msk [vmem:[%s1225_s21 + $0x28] sm:$0xff] %vm496_vm1, %v792_v57 }
 0x38b PF: > { %s21_s9 = sadd.s32 1, %s1081_s9  }
 0x38c   : > { %p18_p2 = scmp.ge.s32.totalorder %s21_s9, 4  }
 0x38e   :  { %20 = sbr.rel (!%p18_p2) target bundleno = 4 (0x4), region = 90 }
 0x393   :  { %825 = vsyncpa [#allocation5], 1 }
 0x394   :  { %827 = vsyncpa [#allocation5 + $0x1], 1 }

</bundles_post_ra>
